<compile_context>
chip_gen: v7x
topology: tpu7x:2x2x1
jax: 0.10.0
libtpu: 0.0.40
codegen_flags: <defaults>
</compile_context>

<pallas_src>
import functools

import jax
import jax.numpy as jnp
from jax import lax
from jax.experimental import pallas as pl
from jax.experimental.pallas import tpu as pltpu

EPS = 1e-5          # nn.BatchNorm1d default eps
NEG_SLOPE = 0.2     # LeakyReLU(0.2)


# ---------------------------------------------------------------------------
# in-kernel helpers (pure jnp, traced inside the Pallas kernels)
# ---------------------------------------------------------------------------
def _leaky_relu(x):
    return jnp.where(x > 0, x, NEG_SLOPE * x)


def _batchnorm_train(h, gamma, beta):
    # training-mode BatchNorm1d: per-feature batch statistics (biased variance)
    mean = jnp.mean(h, axis=0, keepdims=True)
    var = jnp.mean((h - mean) ** 2, axis=0, keepdims=True)
    return (h - mean) * lax.rsqrt(var + EPS) * gamma + beta


def _round_up(x, m):
    return ((x + m - 1) // m) * m


# ---------------------------------------------------------------------------
# Kernel 1: downsample  (Linear -> BN -> LeakyReLU -> Linear), rows = T2*bs
#   BN needs full-batch stats -> single whole-array invocation.
# ---------------------------------------------------------------------------
def downsample_kernel(x_ref, w1_ref, b1_ref, g_ref, be_ref, w2_ref, b2_ref, o_ref):
    w1 = w1_ref[...]
    w2 = w2_ref[...]
    h = jnp.dot(x_ref[...].astype(w1.dtype), w1,
                preferred_element_type=jnp.float32) + b1_ref[...]
    h = _leaky_relu(_batchnorm_train(h, g_ref[...], be_ref[...]))
    o_ref[...] = jnp.dot(h.astype(w2.dtype), w2,
                         preferred_element_type=jnp.float32) + b2_ref[...]


# ---------------------------------------------------------------------------
# Kernel 2: fused 3-layer LSTM stack, time-major, 2-D refs (rows = T*Bp).
#   PyTorch gate order (i, f, g, o); b_ih + b_hh pre-summed into one bias.
# ---------------------------------------------------------------------------
def lstm_stack_kernel(x_ref, *rest, seq_len, batch, hidden, num_layers):
    weights = rest[:3 * num_layers]
    o_ref, gates_scr, act_scr = rest[3 * num_layers:]
    T, Bp, LH = seq_len, batch, hidden

    src = x_ref[...]                                     # (T*Bp, Din) f32
    for layer in range(num_layers):
        wih = weights[3 * layer][...]                    # (Din, 4LH) bf16
        whh = weights[3 * layer + 1][...]                # (LH , 4LH) bf16
        b = weights[3 * layer + 2][...]                  # (1  , 4LH) f32
        mm = wih.dtype
        dst = o_ref if layer == num_layers - 1 else act_scr

        # (a) hoisted input projection: one big MXU matmul over ALL timesteps.
        gates_scr[...] = jnp.dot(src.astype(mm), wih,
                                 preferred_element_type=jnp.float32) + b

        # (b) serial recurrence: only h @ W_hh per step; h/c live in the
        #     fori_loop carry (vregs), no per-step VMEM round-trips.
        def step(t, carry, whh=whh, dst=dst):
            h, c = carry
            row = pl.multiple_of(t * Bp, 8)              # sublane-aligned block
            gates = gates_scr[pl.ds(row, Bp), :] + jnp.dot(
                h.astype(mm), whh, preferred_element_type=jnp.float32)
            # LH is a multiple of 128 -> lane-aligned gate slices.
            i = jax.nn.sigmoid(gates[:, 0 * LH:1 * LH])
            f = jax.nn.sigmoid(gates[:, 1 * LH:2 * LH])
            g = jnp.tanh(gates[:, 2 * LH:3 * LH])
            o = jax.nn.sigmoid(gates[:, 3 * LH:4 * LH])
            c = f * c + i * g
            h = o * jnp.tanh(c)
            dst[pl.ds(row, Bp), :] = h
            return (h, c)

        zeros = jnp.zeros((Bp, LH), jnp.float32)
        # small unroll: lets the per-step matmul / EUP transcendentals of
        # adjacent steps' independent pieces interleave (helps v5e most).
        lax.fori_loop(0, T, step, (zeros, zeros), unroll=2)

        if layer < num_layers - 1:
            src = act_scr[...]                           # next layer's input


# ---------------------------------------------------------------------------
# Kernel 3: fc pre-head (Linear -> BN -> LReLU -> Linear -> BN -> LReLU)
#   BN needs full-batch stats -> single whole-array invocation.
# ---------------------------------------------------------------------------
def fc_pre_kernel(x_ref, w1_ref, b1_ref, g1_ref, be1_ref,
                  w2_ref, b2_ref, g2_ref, be2_ref, o_ref):
    w1 = w1_ref[...]
    w2 = w2_ref[...]
    h = jnp.dot(x_ref[...].astype(w1.dtype), w1,
                preferred_element_type=jnp.float32) + b1_ref[...]
    h = _leaky_relu(_batchnorm_train(h, g1_ref[...], be1_ref[...]))
    h = jnp.dot(h.astype(w2.dtype), w2,
                preferred_element_type=jnp.float32) + b2_ref[...]
    o_ref[...] = _leaky_relu(_batchnorm_train(h, g2_ref[...], be2_ref[...]))


# ---------------------------------------------------------------------------
# Kernel 4: final fc matmul (no BN) — row-tiled grid, lane-dense output.
# ---------------------------------------------------------------------------
def fc_out_kernel(x_ref, w_ref, b_ref, o_ref):
    w = w_ref[...]
    o_ref[...] = jnp.dot(x_ref[...].astype(w.dtype), w,
                         preferred_element_type=jnp.float32) + b_ref[...]


# ---------------------------------------------------------------------------
# pallas_call glue
# ---------------------------------------------------------------------------
def _call_vmem(kernel, out_shape, args):
    return pl.pallas_call(
        kernel,
        out_shape=out_shape,
        in_specs=[pl.BlockSpec(memory_space=pltpu.MemorySpace.VMEM)] * len(args),
        out_specs=pl.BlockSpec(memory_space=pltpu.MemorySpace.VMEM),
    )(*args)


# ---------------------------------------------------------------------------
# Model wrapper (parameters initialized deterministically in-script)
# ---------------------------------------------------------------------------
class Audio2FeaturePallas:
    # Module defaults are APC_hidden_size=512, lstm_hidden=256, fc_hidden=512,
    # A2L_GMM_ndim=75, predict_length=90; the demo keeps the same structure at
    # small, lane-aligned widths (lstm/fc hidden and output_size = 128).
    def __init__(self, key, APC_hidden_size=32, lstm_hidden=128, fc_hidden=128,
                 A2L_GMM_ndim=16, predict_length=8, num_lstm_layers=3,
                 mm_dtype=jnp.bfloat16):
        self.H = APC_hidden_size
        self.LH = lstm_hidden
        self.FH = fc_hidden
        self.output_size = A2L_GMM_ndim * predict_length   # loss == 'L2'
        self.mm_dtype = mm_dtype
        ks = iter(jax.random.split(key, 64))

        def dense(kin, kout, fan_in):
            w = (jax.random.normal(next(ks), (kin, kout), jnp.float32)
                 / jnp.sqrt(float(fan_in))).astype(mm_dtype)
            b = 0.01 * jax.random.normal(next(ks), (1, kout), jnp.float32)
            return w, b

        H, LH, FH = self.H, self.LH, self.FH
        # downsample: Linear(2H->H), BN(H), LeakyReLU, Linear(H->H)
        self.dw1, self.db1 = dense(2 * H, H, 2 * H)
        self.dg = jnp.ones((1, H), jnp.float32)
        self.dbe = 0.01 * jax.random.normal(next(ks), (1, H), jnp.float32)
        self.dw2, self.db2 = dense(H, H, H)

        # LSTM: 3 layers, input sizes H, LH, LH (b = b_ih + b_hh combined)
        self.lstm = []
        in_dim = H
        for _ in range(num_lstm_layers):
            w_ih = (jax.random.normal(next(ks), (in_dim, 4 * LH), jnp.float32)
                    / jnp.sqrt(float(in_dim))).astype(mm_dtype)
            w_hh = (jax.random.normal(next(ks), (LH, 4 * LH), jnp.float32)
                    / jnp.sqrt(float(LH))).astype(mm_dtype)
            b = 0.01 * jax.random.normal(next(ks), (1, 4 * LH), jnp.float32)
            self.lstm.append((w_ih, w_hh, b))
            in_dim = LH

        # fc: Linear(LH->FH), BN, LReLU, Linear(FH->FH), BN, LReLU, Linear(FH->out)
        self.fw1, self.fb1 = dense(LH, FH, LH)
        self.fg1 = jnp.ones((1, FH), jnp.float32)
        self.fbe1 = 0.01 * jax.random.normal(next(ks), (1, FH), jnp.float32)
        self.fw2, self.fb2 = dense(FH, FH, FH)
        self.fg2 = jnp.ones((1, FH), jnp.float32)
        self.fbe2 = 0.01 * jax.random.normal(next(ks), (1, FH), jnp.float32)
        self.fw3, self.fb3 = dense(FH, self.output_size, FH)

    # ---- row-tiled final matmul (parallel grid, weights untiled in VMEM) ---
    def _fc_out(self, h, row_tile=256):
        rows, in_dim = h.shape
        out_dim = self.output_size
        tile = min(row_tile, _round_up(rows, 8))
        rows_pad = _round_up(rows, tile)
        if rows_pad != rows:
            h = jnp.pad(h, ((0, rows_pad - rows), (0, 0)))
        out = pl.pallas_call(
            fc_out_kernel,
            out_shape=jax.ShapeDtypeStruct((rows_pad, out_dim), jnp.float32),
            grid=(rows_pad // tile,),
            in_specs=[
                pl.BlockSpec((tile, in_dim), lambda i: (i, 0)),
                pl.BlockSpec((in_dim, out_dim), lambda i: (0, 0)),   # full weight
                pl.BlockSpec((1, out_dim), lambda i: (0, 0)),        # full bias
            ],
            out_specs=pl.BlockSpec((tile, out_dim), lambda i: (i, 0)),
            compiler_params=pltpu.CompilerParams(
                dimension_semantics=("parallel",),
                vmem_limit_bytes=32 * 1024 * 1024,
            ),
        )(h, self.fw3, self.fb3)
        return out[:rows]

    # ---- Pallas forward -------------------------------------------------
    def __call__(self, audio_features):
        bs, item_len, ndim = audio_features.shape
        assert ndim == self.H and item_len % 2 == 0
        T2 = item_len // 2
        H, LH, FH = self.H, self.LH, self.FH

        # go time-major ONCE; all row-wise stages (dense / BN) are row-order
        # invariant, so we stay time-major until the very end.
        x = audio_features.reshape(bs, T2, 2 * H)                 # pair frames
        x_tm = jnp.transpose(x, (1, 0, 2)).reshape(T2 * bs, 2 * H)

        down = _call_vmem(
            downsample_kernel,
            jax.ShapeDtypeStruct((T2 * bs, H), jnp.float32),
            (x_tm, self.dw1, self.db1, self.dg, self.dbe, self.dw2, self.db2),
        )                                                          # (T2*bs, H)

        # pad batch to a multiple of 8 so each timestep is an aligned row block
        Bp = _round_up(bs, 8)
        xt = down.reshape(T2, bs, H)
        if Bp != bs:
            xt = jnp.pad(xt, ((0, 0), (0, Bp - bs), (0, 0)))
        x_lstm = xt.reshape(T2 * Bp, H)

        lstm_weights = []
        for (w_ih, w_hh, b) in self.lstm:
            lstm_weights += [w_ih, w_hh, b]

        kern = functools.partial(lstm_stack_kernel, seq_len=T2, batch=Bp,
                                 hidden=LH, num_layers=len(self.lstm))
        lstm_out = pl.pallas_call(
            kern,
            out_shape=jax.ShapeDtypeStruct((T2 * Bp, LH), jnp.float32),
            in_specs=[pl.BlockSpec(memory_space=pltpu.MemorySpace.VMEM)]
                     * (1 + len(lstm_weights)),
            out_specs=pl.BlockSpec(memory_space=pltpu.MemorySpace.VMEM),
            scratch_shapes=[
                pltpu.VMEM((T2 * Bp, 4 * LH), jnp.float32),   # precomputed gates
                pltpu.VMEM((T2 * Bp, LH), jnp.float32),       # inter-layer act
            ],
        )(x_lstm, *lstm_weights)

        # drop batch padding, keep time-major row order for the fc head
        y = lstm_out.reshape(T2, Bp, LH)[:, :bs, :].reshape(T2 * bs, LH)

        h = _call_vmem(
            fc_pre_kernel,
            jax.ShapeDtypeStruct((T2 * bs, FH), jnp.float32),
            (y, self.fw1, self.fb1, self.fg1, self.fbe1,
             self.fw2, self.fb2, self.fg2, self.fbe2),
        )

        pred_tm = self._fc_out(h)                                  # (T2*bs, out)

        # single transpose back to batch-major at the very end
        return jnp.transpose(pred_tm.reshape(T2, bs, self.output_size), (1, 0, 2))

    # ---- pure-JAX f32 reference (PyTorch-faithful, batch-major) ----------
    def reference(self, audio_features):
        f32 = lambda a: a.astype(jnp.float32)
        bs, item_len, ndim = audio_features.shape
        T2 = item_len // 2
        x = audio_features.reshape(bs, T2, ndim * 2).reshape(-1, ndim * 2)
        h = x @ f32(self.dw1) + self.db1
        h = _leaky_relu(_batchnorm_train(h, self.dg, self.dbe))
        down = (h @ f32(self.dw2) + self.db2).reshape(bs, T2, self.H)

        y = down
        LH = self.LH
        for (w_ih, w_hh, b) in self.lstm:
            w_ih, w_hh = f32(w_ih), f32(w_hh)

            def step(carry, x_t, w_ih=w_ih, w_hh=w_hh, b=b):
                hh, cc = carry
                gates = x_t @ w_ih + hh @ w_hh + b
                i = jax.nn.sigmoid(gates[:, 0 * LH:1 * LH])
                f = jax.nn.sigmoid(gates[:, 1 * LH:2 * LH])
                g = jnp.tanh(gates[:, 2 * LH:3 * LH])
                o = jax.nn.sigmoid(gates[:, 3 * LH:4 * LH])
                cc = f * cc + i * g
                hh = o * jnp.tanh(cc)
                return (hh, cc), hh

            x_tbd = jnp.transpose(y, (1, 0, 2))
            init = (jnp.zeros((bs, LH), jnp.float32),
                    jnp.zeros((bs, LH), jnp.float32))
            _, ys = lax.scan(step, init, x_tbd)
            y = jnp.transpose(ys, (1, 0, 2))

        flat = y.reshape(-1, LH)
        h = flat @ f32(self.fw1) + self.fb1
        h = _leaky_relu(_batchnorm_train(h, self.fg1, self.fbe1))
        h = h @ f32(self.fw2) + self.fb2
        h = _leaky_relu(_batchnorm_train(h, self.fg2, self.fbe2))
        pred = h @ f32(self.fw3) + self.fb3
        return pred.reshape(bs, T2, -1)


if __name__ == "__main__":
    key = jax.random.PRNGKey(0)
    kp, kx = jax.random.split(key)

    B, T, H = 2, 8, 32          # audio_features: [B, T, ndim] with ndim == APC_hidden_size
    model = Audio2FeaturePallas(kp, APC_hidden_size=H, lstm_hidden=128, fc_hidden=128,
                                A2L_GMM_ndim=16, predict_length=8)

    audio_features = jax.random.normal(kx, (B, T, H), jnp.float32)

    pred = jax.block_until_ready(model(audio_features))
    ref = jax.block_until_ready(model.reference(audio_features))

    assert pred.shape == (B, T // 2, model.output_size), pred.shape
    # Kernel runs bf16 matmul inputs with f32 accumulation vs. an all-f32
    # reference (same bf16-quantized weight values) -> allow ~1e-2-level error.
    err = float(jnp.max(jnp.abs(pred - ref)))
    assert jnp.allclose(pred, ref, rtol=5e-2, atol=5e-2), err
    print("KERNEL_OK")
</pallas_src>

<mosaic_0001>
module attributes {stable_mosaic.version = 11 : i64} {
  func.func @downsample_kernel(%arg0: memref<8x64xf32, #tpu.memory_space<vmem>>, %arg1: memref<64x32xbf16, #tpu.memory_space<vmem>>, %arg2: memref<1x32xf32, #tpu.memory_space<vmem>>, %arg3: memref<1x32xf32, #tpu.memory_space<vmem>>, %arg4: memref<1x32xf32, #tpu.memory_space<vmem>>, %arg5: memref<32x32xbf16, #tpu.memory_space<vmem>>, %arg6: memref<1x32xf32, #tpu.memory_space<vmem>>, %arg7: memref<8x32xf32, #tpu.memory_space<vmem>>) attributes {dimension_semantics = [], scalar_prefetch = 0 : i64, scratch_operands = 0 : i64, tpu.core_type = #tpu.core_type<tc>} {
    %c0 = arith.constant 0 : index
    %c0_0 = arith.constant 0 : index
    %0 = vector.load %arg1[%c0, %c0_0] : memref<64x32xbf16, #tpu.memory_space<vmem>>, vector<64x32xbf16>
    %c0_1 = arith.constant 0 : index
    %c0_2 = arith.constant 0 : index
    %1 = vector.load %arg5[%c0_1, %c0_2] : memref<32x32xbf16, #tpu.memory_space<vmem>>, vector<32x32xbf16>
    %c0_3 = arith.constant 0 : index
    %c0_4 = arith.constant 0 : index
    %2 = vector.load %arg0[%c0_3, %c0_4] : memref<8x64xf32, #tpu.memory_space<vmem>>, vector<8x64xf32>
    %3 = arith.truncf %2 : vector<8x64xf32> to vector<8x64xbf16>
    %cst = arith.constant dense<0.000000e+00> : vector<8x32xf32>
    %4 = tpu.matmul %3, %0, %cst {dimension_numbers = #tpu.dot_dimension_numbers<[1], [0], [0], [1], [0, 0, 1, 1], [], []>} : vector<8x64xbf16>, vector<64x32xbf16>, vector<8x32xf32> -> vector<8x32xf32>
    %c0_5 = arith.constant 0 : index
    %c0_6 = arith.constant 0 : index
    %5 = vector.load %arg2[%c0_5, %c0_6] : memref<1x32xf32, #tpu.memory_space<vmem>>, vector<1x32xf32>
    %6 = vector.broadcast %5 : vector<1x32xf32> to vector<8x32xf32>
    %7 = arith.addf %4, %6 : vector<8x32xf32>
    %c0_7 = arith.constant 0 : index
    %c0_8 = arith.constant 0 : index
    %8 = vector.load %arg3[%c0_7, %c0_8] : memref<1x32xf32, #tpu.memory_space<vmem>>, vector<1x32xf32>
    %c0_9 = arith.constant 0 : index
    %c0_10 = arith.constant 0 : index
    %9 = vector.load %arg4[%c0_9, %c0_10] : memref<1x32xf32, #tpu.memory_space<vmem>>, vector<1x32xf32>
    %cst_11 = arith.constant dense<0.000000e+00> : vector<32xf32>
    %10 = vector.multi_reduction <add>, %7, %cst_11 [0] : vector<8x32xf32> to vector<32xf32>
    %11 = vector.shape_cast %10 : vector<32xf32> to vector<1x32xf32>
    %cst_12 = arith.constant 8.000000e+00 : f32
    %12 = vector.broadcast %cst_12 : f32 to vector<1x32xf32>
    %13 = arith.divf %11, %12 : vector<1x32xf32>
    %14 = vector.broadcast %13 : vector<1x32xf32> to vector<8x32xf32>
    %15 = arith.subf %7, %14 : vector<8x32xf32>
    %16 = arith.mulf %15, %15 : vector<8x32xf32>
    %cst_13 = arith.constant dense<0.000000e+00> : vector<32xf32>
    %17 = vector.multi_reduction <add>, %16, %cst_13 [0] : vector<8x32xf32> to vector<32xf32>
    %18 = vector.shape_cast %17 : vector<32xf32> to vector<1x32xf32>
    %cst_14 = arith.constant 8.000000e+00 : f32
    %19 = vector.broadcast %cst_14 : f32 to vector<1x32xf32>
    %20 = arith.divf %18, %19 : vector<1x32xf32>
    %21 = vector.broadcast %13 : vector<1x32xf32> to vector<8x32xf32>
    %22 = arith.subf %7, %21 : vector<8x32xf32>
    %cst_15 = arith.constant 9.99999974E-6 : f32
    %23 = vector.broadcast %cst_15 : f32 to vector<1x32xf32>
    %24 = arith.addf %20, %23 : vector<1x32xf32>
    %25 = math.rsqrt %24 : vector<1x32xf32>
    %26 = vector.broadcast %25 : vector<1x32xf32> to vector<8x32xf32>
    %27 = arith.mulf %22, %26 : vector<8x32xf32>
    %28 = vector.broadcast %8 : vector<1x32xf32> to vector<8x32xf32>
    %29 = arith.mulf %27, %28 : vector<8x32xf32>
    %30 = vector.broadcast %9 : vector<1x32xf32> to vector<8x32xf32>
    %31 = arith.addf %29, %30 : vector<8x32xf32>
    %cst_16 = arith.constant 0.000000e+00 : f32
    %32 = vector.broadcast %cst_16 : f32 to vector<8x32xf32>
    %33 = arith.cmpf ogt, %31, %32 : vector<8x32xf32>
    %cst_17 = arith.constant 2.000000e-01 : f32
    %34 = vector.broadcast %cst_17 : f32 to vector<8x32xf32>
    %35 = arith.mulf %34, %31 : vector<8x32xf32>
    %36 = arith.select %33, %31, %35 : vector<8x32xi1>, vector<8x32xf32>
    %37 = arith.truncf %36 : vector<8x32xf32> to vector<8x32xbf16>
    %cst_18 = arith.constant dense<0.000000e+00> : vector<8x32xf32>
    %38 = tpu.matmul %37, %1, %cst_18 {dimension_numbers = #tpu.dot_dimension_numbers<[1], [0], [0], [1], [0, 0, 1, 1], [], []>} : vector<8x32xbf16>, vector<32x32xbf16>, vector<8x32xf32> -> vector<8x32xf32>
    %c0_19 = arith.constant 0 : index
    %c0_20 = arith.constant 0 : index
    %39 = vector.load %arg6[%c0_19, %c0_20] : memref<1x32xf32, #tpu.memory_space<vmem>>, vector<1x32xf32>
    %40 = vector.broadcast %39 : vector<1x32xf32> to vector<8x32xf32>
    %41 = arith.addf %38, %40 : vector<8x32xf32>
    %c0_21 = arith.constant 0 : index
    %c0_22 = arith.constant 0 : index
    %42 = vector.load %arg7[%c0_21, %c0_22] : memref<8x32xf32, #tpu.memory_space<vmem>>, vector<8x32xf32>
    tpu.vector_store %arg7[%c0_21, %c0_22], %41 {strides = array<i32>} : memref<8x32xf32, #tpu.memory_space<vmem>>, vector<8x32xf32>,
    return
  }
}

</mosaic_0001>

<bundles_post_ra>
// kernel: tpu_custom_call.1
= control target key start
LH: loop header
LB: loop body
LE: loop exit
PB: predicated region body
PF: predicated region fallthrough
CT: control target
= control target key end

     0   :  { %v312_v1 = vmov 0.0   ;;  %vm313_vm0 = vmmov 0   ;;  %s404_s0 = inlined_call_operand.vmem [shape: f32[8,64], index: 0, kind: input, shape index: {}]   ;;  %s405_s1 = inlined_call_operand.vmem [shape: bf16[64,32], index: 1, kind: input, shape index: {}]   ;;  %s406_s2 = inlined_call_operand.vmem [shape: f32[1,32], index: 2, kind: input, shape index: {}]   ;;  %s407_s3 = inlined_call_operand.vmem [shape: f32[1,32], index: 3, kind: input, shape index: {}]   ;;  %s408_s4 = inlined_call_operand.vmem [shape: f32[1,32], index: 4, kind: input, shape index: {}]   ;;  %s409_s5 = inlined_call_operand.vmem [shape: bf16[32,32], index: 5, kind: input, shape index: {}]   ;;  %s410_s6 = inlined_call_operand.vmem [shape: f32[1,32], index: 6, kind: input, shape index: {}]   ;;  %s411_s7 = inlined_call_operand.hbm [shape: f32[8,32], index: 7, kind: output, shape index: {}]  }
   0x1   :  { %v280_v0 = vld [vmem:[%s405_s1] sm:$0xff]   ;;  %257 = vmatprep.subr.bf16.mxu0 %v312_v1  ;;  %269 = vmatprep.subr.bf16.mxu1 %v312_v1  ;;  %v281_v2 = vld [vmem:[%s405_s1 + $0x8] sm:$0xff]   ;;  %v282_v3 = vld [vmem:[%s405_s1 + $0x10] sm:$0xff]  }
   0x2   :  { %258 = vmatpush3.bf16.msra.mxu0 %v280_v0  ;;  %265 = vmatprep.mubr.msk.bf16.mxu0 %vm313_vm0, %v312_v1 }
   0x3   :  { %259 = vmatprep.subr.bf16.mxu0 %v312_v1  ;;  %273 = vmatprep.mubr.msk.bf16.mxu1 %vm313_vm0, %v312_v1 }
   0x6   :  { %260 = vmatpush3.bf16.msra.mxu0 %v281_v2 }
   0x7   :  { %12 = vsyncpa [#allocation3], 0  ;;  %261 = vmatprep.subr.bf16.mxu0 %v312_v1  ;;  %v283_v4 = vld [vmem:[%s405_s1 + $0x18] sm:$0xff]   ;;  %v40_v5 = vld [vmem:[%s404_s0] sm:$0xff]  ;;  %vm73_vm1 = vcmask 523264   ;;  %vm119_vm2 = vcmask 261120  }
   0x8   :  { %v41_v6 = vpack.c.bf16 %v40_v5, %v40_v5  ;;  %v284_v7 = vld [vmem:[%s409_s5] sm:$0xff]   ;;  %v285_v8 = vld [vmem:[%s409_s5 + $0x8] sm:$0xff]   ;;  %s314_s19 = smov [#allocation2]  }
   0x9   :  { %270 = vmatpush3.bf16.msra.mxu1 %v284_v7  ;;  %v237_v9 = vld [vmem:[%s406_s2] ss:$0 sm:$0xff]  ;;  %s229_s20 = sshll.u32 %s314_s19, 4  ;;  %s230_s20 = int_to_ptr.vmem [resolvable:$true] %s229_s20 }
   0xa   :  { %262 = vmatpush3.bf16.msra.mxu0 %v282_v3  ;;  %271 = vmatprep.subr.bf16.mxu1 %v312_v1  ;;  %v243_v35 = vld [vmem:[%s407_s3] ss:$0 sm:$0xff]  ;;  %s288_s3 = scalar_lea.vmem %s230_s20, 128  ;;  %p293_p1 = scmp.lt.s32.totalorder %s230_s20, %s230_s20 }
   0xb   :  { %263 = vmatprep.subr.bf16.mxu0 %v312_v1  ;;  %v244_v37 = vld [vmem:[%s408_s4] ss:$0 sm:$0xff]  ;;  %p289_p0 = scmp.ne.s32.totalorder %s230_s20, %s288_s3  ;;  %p294_p2 = scmp.lt.s32.totalorder %s288_s3, %s288_s3 }
   0xc   :  { %v245_v43 = vld [vmem:[%s410_s6] ss:$0 sm:$0xff] }
   0xd   :  { %272 = vmatpush3.bf16.msra.mxu1 %v285_v8  ;;  %p295_p3 = por %p294_p2, %p293_p1 }
   0xe   :  { %264 = vmatpush3.bf16.msra.mxu0 %v283_v4 }
   0xf   :  { %p296_p4 = pnand %p295_p3, %p289_p0 }
  0x11   :  { %266 = vmatmul.mubr.msk.bf16.vlgmr.msra.gmra.mrb[0].mxu0 %vm73_vm1, %v41_v6 }
  0xe4   :  { %v111_v10 = vpop.f32.mrb[0].mxu0 }
  0xe5   :  { %v112_v11 = vadd.f32 %v237_v9, %v111_v10  ;;  %v267_v12 = vpop.f32.mrb[1].mxu0 }
  0xe6   :  { %v114_v13 = vpop.f32.mrb[2].mxu0 }
  0xe7   :  { %v120_v14 = vsel %vm119_vm2, %v112_v11, 0.0  ;;  %v268_v15 = vpop.f32.mrb[3].mxu0 }
  0xe8   :  { %v121_v16 = vrot.slane %v120_v14, 4 }
  0xea   :  { %v122_v17 = vadd.f32 %v121_v16, %v120_v14 }
  0xec   :  { %v123_v18 = vrot.slane %v122_v17, 2 }
  0xee   :  { %v124_v19 = vadd.f32 %v123_v18, %v122_v17 }
  0xf0   :  { %v125_v20 = vrot.slane %v124_v19, 1 }
  0xf2   :  { %v126_v21 = vadd.f32 %v125_v20, %v124_v19 }
  0xf4   :  { %v128_v22 = vmul.f32 0.125, %v126_v21 }
  0xf6   :  { %v129_v23 = vsub.f32 %v112_v11, %v128_v22 }
  0xf8   :  { %v130_v24 = vmul.f32 %v129_v23, %v129_v23 }
  0xfa   :  { %v131_v25 = vsel %vm119_vm2, %v130_v24, 0.0 }
  0xfb   :  { %v132_v26 = vrot.slane %v131_v25, 4 }
  0xfd   :  { %v133_v27 = vadd.f32 %v132_v26, %v131_v25 }
  0xff   :  { %v134_v28 = vrot.slane %v133_v27, 2 }
 0x101   :  { %v135_v29 = vadd.f32 %v134_v28, %v133_v27 }
 0x103   :  { %v136_v30 = vrot.slane %v135_v29, 1 }
 0x105   :  { %v137_v31 = vadd.f32 %v136_v30, %v135_v29 }
 0x107   :  { %v138_v32 = vmul.f32 0.125, %v137_v31 }
 0x109   :  { %v139_v33 = vadd.f32 1e-05, %v138_v32 }
 0x10b   :  { %286 = vrsqrt.f32 %v139_v33 }
 0x115   :  { %v287_v34 = vpop.eup %286 }
 0x116   :  { %v141_v36 = vmul.f32 %v287_v34, %v129_v23 }
 0x118   :  { %v148_v38 = vmul.f32 %v243_v35, %v141_v36 }
 0x11a   :  { %v155_v39 = vadd.f32 %v244_v37, %v148_v38 }
 0x11c   :  { %vm156_vm3 = vcmp.gt.f32.partialorder %v155_v39, 0.0  ;;  %v157_v40 = vmul.f32 0.2, %v155_v39 }
 0x11e   :  { %v158_v41 = vsel %vm156_vm3, %v155_v39, %v157_v40 }
 0x11f   :  { %v159_v42 = vpack.c.bf16 %v158_v41, %v158_v41 }
 0x121   :  { %274 = vmatmul.mubr.msk.bf16.vlgmr.msra.gmra.mrb[0].mxu1 %vm119_vm2, %v159_v42 }
 0x1f4   :  { %v216_v44 = vpop.f32.mrb[0].mxu1 }
 0x1f5   :  { %v217_v45 = vadd.f32 %v245_v43, %v216_v44  ;;  %v275_v46 = vpop.f32.mrb[1].mxu1 }
 0x1f6   :  { %v219_v47 = vpop.f32.mrb[2].mxu1 }
 0x1f7   :  { %222 = vst.msk [vmem:[#allocation2] sm:$0xff] %vm119_vm2, %v217_v45  ;;  %v276_v48 = vpop.f32.mrb[3].mxu1 }
 0x1f8   :  { %299 = shalt.err (!%p296_p4)
}
 0x1f9   :  { %s300_s6 = scalar_lea.hbm %s411_s7, 128 }
 0x1fa   :  { %p301_p5 = scmp.ne.s32.totalorder %s411_s7, %s300_s6  ;;  %p304_p6 = scmp.lt.u32.totalorder %s300_s6, %s411_s7 }
 0x1fc   :  { %p306_p7 = pnand %p304_p6, %p301_p5 }
 0x1fe   :  { %309 = shalt.err (!%p306_p7)
}
 0x1ff   :  { %232 = dma.vmem_to_hbm [thread:$0]  %s230_s20, 128, %s411_s7, [#allocation3]  }
 0x200   :  { %310 = dma.done.wait [#allocation3], 128  }
 0x201   :  { %311 = vsyncadd [#allocation3], 4294967168 }
 0x202   :  { %236 = vsyncpa [#allocation3], 1 }

</bundles_post_ra>
